<compile_context>
chip_gen: v7x
topology: tpu7x:2x2x1
jax: 0.10.0
libtpu: 0.0.40
codegen_flags: <defaults>
</compile_context>

<pallas_src>
import functools

import jax
import jax.numpy as jnp
from jax.experimental import pallas as pl
from jax.experimental.pallas import tpu as pltpu


def _round_up(x, m):
    return ((x + m - 1) // m) * m


def _pick_tile(dim, granule, cap):
    """Largest multiple of `granule` that divides `dim` and is <= cap."""
    cap = max(granule, min(cap, dim))
    best = granule
    t = granule
    while t <= cap:
        if dim % t == 0:
            best = t
        t += granule
    return best


# ----------------------------- kernels --------------------------------------

def _single_block_kernel(x_ref, w_ref, b_ref, o_ref, *, compute_dtype):
    # Whole (padded) problem fits in one VMEM window: no grid bookkeeping.
    acc = jnp.dot(x_ref[...].astype(compute_dtype), w_ref[...],
                  preferred_element_type=jnp.float32)
    o_ref[...] = (acc + b_ref[...]).astype(o_ref.dtype)


def _tiled_kernel_f32_out(x_ref, w_ref, b_ref, o_ref, *, compute_dtype):
    # Output block is resident across the K axis -> accumulate into it
    # directly (f32 output), bias is the k==0 initializer. No scratch.
    k = pl.program_id(2)

    @pl.when(k == 0)
    def _init():
        o_ref[...] = jnp.broadcast_to(b_ref[...], o_ref.shape)

    o_ref[...] += jnp.dot(x_ref[...].astype(compute_dtype), w_ref[...],
                          preferred_element_type=jnp.float32)


def _tiled_kernel_lowp_out(x_ref, w_ref, b_ref, o_ref, acc_ref, *, compute_dtype):
    # Low-precision output: keep an f32 VMEM accumulator, write once at the end.
    k = pl.program_id(2)

    @pl.when(k == 0)
    def _init():
        acc_ref[...] = jnp.broadcast_to(b_ref[...], acc_ref.shape)

    acc_ref[...] += jnp.dot(x_ref[...].astype(compute_dtype), w_ref[...],
                            preferred_element_type=jnp.float32)

    @pl.when(k == pl.num_programs(2) - 1)
    def _finalize():
        o_ref[...] = acc_ref[...].astype(o_ref.dtype)


# ----------------------------- wrappers --------------------------------------

def prepare_linear_params(w, b, *, compute_dtype=jnp.bfloat16):
    """One-time parameter prep (hoist out of the per-call path).

    w: [Out, In] torch layout, b: [Out].  Returns the weight transposed to
    [In_p, Out_p], zero-padded to (128, 128) granularity and cast to the MXU
    compute dtype, plus the bias as a (1, Out_p) f32 row.
    """
    out_features, in_features = w.shape
    assert b.shape == (out_features,), "bias / weight size mismatch"
    kp = _round_up(in_features, 128)
    np_ = _round_up(out_features, 128)
    w_t = jnp.pad(w.T, ((0, kp - in_features), (0, np_ - out_features)))
    b_p = jnp.pad(b, (0, np_ - out_features)).astype(jnp.float32).reshape(1, np_)
    return dict(
        w=w_t.astype(compute_dtype),
        b=b_p,
        in_features=in_features,
        out_features=out_features,
        compute_dtype=compute_dtype,
    )


def baseline_linear_forward(x, params, *, max_tm=512, max_tn=512, max_tk=None,
                            vmem_limit_bytes=32 * 1024 * 1024):
    """Pallas TPU forward of nn.Linear with pre-prepared params."""
    w_p = params["w"]
    b_p = params["b"]
    in_features = params["in_features"]
    out_features = params["out_features"]
    compute_dtype = params["compute_dtype"]

    batch, in_x = x.shape
    assert in_x == in_features, "weight / input size mismatch"

    kp, np_ = w_p.shape
    mp = _round_up(batch, 8)

    if max_tk is None:
        # bf16 weight tiles are half the bytes -> afford 2x deeper K tiles.
        max_tk = 1024 if jnp.dtype(compute_dtype).itemsize <= 2 else 512

    # Tiles are exact divisors of the (8, 128)-padded dims: no tile-granularity
    # padding waste, every load/store lane-dense and unmasked.
    tm = _pick_tile(mp, 8, max_tm)
    tk = _pick_tile(kp, 128, max_tk)
    tn = _pick_tile(np_, 128, max_tn)

    gm, gn, gk = mp // tm, np_ // tn, kp // tk

    # Megacore: if the grid would be (1, 1, K) with K > 1, split N so both
    # v7x TensorCores get a parallel block instead of one sitting idle.
    if gm * gn == 1 and gk > 1 and np_ >= 256:
        tn = _pick_tile(np_, 128, np_ // 2)
        gn = np_ // tn

    # Per-call x padding only (x changes every call; it is the small operand).
    x_p = x if (mp == batch and kp == in_x) else jnp.pad(
        x, ((0, mp - batch), (0, kp - in_x)))

    grid = (gm, gn, gk)

    if grid == (1, 1, 1):
        kernel = functools.partial(_single_block_kernel,
                                   compute_dtype=compute_dtype)
        y_p = pl.pallas_call(
            kernel,
            out_shape=jax.ShapeDtypeStruct((mp, np_), x.dtype),
            in_specs=[pl.BlockSpec(memory_space=pltpu.MemorySpace.VMEM)] * 3,
            out_specs=pl.BlockSpec(memory_space=pltpu.MemorySpace.VMEM),
            compiler_params=pltpu.CompilerParams(
                vmem_limit_bytes=vmem_limit_bytes),
        )(x_p, w_p, b_p)
    else:
        f32_out = jnp.dtype(x.dtype) == jnp.dtype(jnp.float32)
        if f32_out:
            kernel = functools.partial(_tiled_kernel_f32_out,
                                       compute_dtype=compute_dtype)
            scratch_shapes = []
        else:
            kernel = functools.partial(_tiled_kernel_lowp_out,
                                       compute_dtype=compute_dtype)
            scratch_shapes = [pltpu.VMEM((tm, tn), jnp.float32)]

        y_p = pl.pallas_call(
            kernel,
            out_shape=jax.ShapeDtypeStruct((mp, np_), x.dtype),
            grid_spec=pltpu.PrefetchScalarGridSpec(
                num_scalar_prefetch=0,
                grid=grid,
                in_specs=[
                    pl.BlockSpec((tm, tk), lambda i, j, k: (i, k)),
                    # If the weight DMA is still exposed behind a skinny
                    # (tm ~ 8-16) matmul, pipeline_mode=pl.Buffered(3) here
                    # deepens the weight pipeline by one extra buffer.
                    pl.BlockSpec((tk, tn), lambda i, j, k: (k, j)),
                    pl.BlockSpec((1, tn), lambda i, j, k: (0, j)),
                ],
                out_specs=pl.BlockSpec((tm, tn), lambda i, j, k: (i, j)),
                scratch_shapes=scratch_shapes,
            ),
            compiler_params=pltpu.CompilerParams(
                # M / N shard across TensorCores (matters on v7x); K is the
                # reduction axis carried by the resident output -> arbitrary.
                dimension_semantics=("parallel", "parallel", "arbitrary"),
                vmem_limit_bytes=vmem_limit_bytes,
            ),
        )(x_p, w_p, b_p)

    return y_p[:batch, :out_features]


def baseline_linear(x, w, b, *, compute_dtype=jnp.bfloat16, **kwargs):
    """Convenience one-shot wrapper (prep + forward).

    For repeated calls, hoist prepare_linear_params() to parameter setup.
    """
    params = prepare_linear_params(w, b, compute_dtype=compute_dtype)
    return baseline_linear_forward(x, params, **kwargs)


def reference_linear(x, w, b):
    # Full-precision reference of nn.Linear.forward.
    return jnp.dot(x, w.T, precision=jax.lax.Precision.HIGHEST) + b


if __name__ == "__main__":
    key = jax.random.PRNGKey(0)

    # --- Case 1: small Linear (single-block fast path), both precisions ----
    batch, input_size, output_size = 8, 32, 16
    k1, k2, k3, key = jax.random.split(key, 4)
    x = jax.random.normal(k1, (batch, input_size), dtype=jnp.float32)
    bound = 1.0 / (input_size ** 0.5)
    w = jax.random.uniform(k2, (output_size, input_size), dtype=jnp.float32,
                           minval=-bound, maxval=bound)   # torch weight [out, in]
    b = jax.random.uniform(k3, (output_size,), dtype=jnp.float32,
                           minval=-bound, maxval=bound)
    y_ref = reference_linear(x, w, b)

    # Default: bf16 MXU inputs, f32 accumulation (fast on every TPU generation).
    params_bf16 = prepare_linear_params(w, b)
    y = jax.block_until_ready(baseline_linear_forward(x, params_bf16))
    assert y.shape == (batch, output_size)
    assert jnp.allclose(y, y_ref, atol=5e-2, rtol=5e-2), "bf16 small-case mismatch"

    # Exact-numerics escape hatch: f32 MXU inputs.
    params_f32 = prepare_linear_params(w, b, compute_dtype=jnp.float32)
    y_exact = jax.block_until_ready(baseline_linear_forward(x, params_f32))
    assert jnp.allclose(y_exact, y_ref, atol=1e-4, rtol=1e-5), "f32 small-case mismatch"

    # --- Case 2: exercise the tiled (M, N, K)-grid accumulator path --------
    B2, In2, Out2 = 16, 1536, 768
    k4, k5, k6, key = jax.random.split(key, 4)
    x2 = jax.random.normal(k4, (B2, In2), dtype=jnp.float32)
    bound2 = 1.0 / (In2 ** 0.5)
    w2 = jax.random.uniform(k5, (Out2, In2), dtype=jnp.float32,
                            minval=-bound2, maxval=bound2)
    b2 = jax.random.uniform(k6, (Out2,), dtype=jnp.float32,
                            minval=-bound2, maxval=bound2)
    y2_ref = reference_linear(x2, w2, b2)

    params2 = prepare_linear_params(w2, b2)          # bf16 default
    y2 = jax.block_until_ready(baseline_linear_forward(x2, params2))
    assert y2.shape == (B2, Out2)
    assert jnp.allclose(y2, y2_ref, atol=5e-2, rtol=5e-2), "bf16 tiled-case mismatch"

    params2_f32 = prepare_linear_params(w2, b2, compute_dtype=jnp.float32)
    y2_exact = jax.block_until_ready(baseline_linear_forward(x2, params2_f32))
    assert jnp.allclose(y2_exact, y2_ref, atol=2e-4, rtol=1e-4), "f32 tiled-case mismatch"

    print("KERNEL_OK")
</pallas_src>

<mosaic_0001>
module attributes {stable_mosaic.version = 11 : i64} {
  func.func @_single_block_kernel(%arg0: memref<8x128xf32, #tpu.memory_space<vmem>>, %arg1: memref<128x128xbf16, #tpu.memory_space<vmem>>, %arg2: memref<1x128xf32, #tpu.memory_space<vmem>>, %arg3: memref<8x128xf32, #tpu.memory_space<vmem>>) attributes {dimension_semantics = [], scalar_prefetch = 0 : i64, scratch_operands = 0 : i64, tpu.core_type = #tpu.core_type<tc>} {
    %c0 = arith.constant 0 : index
    %c0_0 = arith.constant 0 : index
    %0 = vector.load %arg0[%c0, %c0_0] : memref<8x128xf32, #tpu.memory_space<vmem>>, vector<8x128xf32>
    %1 = arith.truncf %0 : vector<8x128xf32> to vector<8x128xbf16>
    %c0_1 = arith.constant 0 : index
    %c0_2 = arith.constant 0 : index
    %2 = vector.load %arg1[%c0_1, %c0_2] : memref<128x128xbf16, #tpu.memory_space<vmem>>, vector<128x128xbf16>
    %cst = arith.constant dense<0.000000e+00> : vector<8x128xf32>
    %3 = tpu.matmul %1, %2, %cst {dimension_numbers = #tpu.dot_dimension_numbers<[1], [0], [0], [1], [0, 0, 1, 1], [], []>} : vector<8x128xbf16>, vector<128x128xbf16>, vector<8x128xf32> -> vector<8x128xf32>
    %c0_3 = arith.constant 0 : index
    %c0_4 = arith.constant 0 : index
    %4 = vector.load %arg2[%c0_3, %c0_4] : memref<1x128xf32, #tpu.memory_space<vmem>>, vector<1x128xf32>
    %5 = vector.broadcast %4 : vector<1x128xf32> to vector<8x128xf32>
    %6 = arith.addf %3, %5 : vector<8x128xf32>
    %c0_5 = arith.constant 0 : index
    %c0_6 = arith.constant 0 : index
    %7 = vector.load %arg3[%c0_5, %c0_6] : memref<8x128xf32, #tpu.memory_space<vmem>>, vector<8x128xf32>
    tpu.vector_store %arg3[%c0_5, %c0_6], %6 {strides = array<i32>} : memref<8x128xf32, #tpu.memory_space<vmem>>, vector<8x128xf32>,
    return
  }
}

</mosaic_0001>

<bundles_post_ra>
// kernel: tpu_custom_call.1
= control target key start
LH: loop header
LB: loop body
LE: loop exit
PB: predicated region body
PF: predicated region fallthrough
CT: control target
= control target key end

     0   :  { %8 = vsyncpa [#allocation3], 0  ;;  %s370_s0 = inlined_call_operand.hbm [shape: f32[8,128], index: 0, kind: input, shape index: {}]   ;;  %s371_s1 = inlined_call_operand.hbm [shape: bf16[128,128], index: 1, kind: input, shape index: {}]   ;;  %s372_s2 = inlined_call_operand.vmem [shape: f32[1,128], index: 2, kind: input, shape index: {}]   ;;  %s373_s3 = inlined_call_operand.hbm [shape: f32[8,128], index: 3, kind: output, shape index: {}]  }
   0x1   :  { %9 = vsyncpa [#allocation6], 0 }
   0x2   :  { %10 = vsyncpa [#allocation4], 0  ;;  %s297_s12 = smov [#allocation2]   ;;  %s298_s14 = smov [#allocation5]  }
   0x3   :  { %s17_s13 = sshll.u32 %s297_s12, 4  ;;  %s26_s15 = sshll.u32 %s298_s14, 4  ;;  %s18_s13 = int_to_ptr.vmem [resolvable:$true] %s17_s13  ;;  %s324_s15 = int_to_ptr.vmem [resolvable:$true] %s26_s15 }
   0x4   :  { %s225_s18 = scalar_lea.hbm %s370_s0, 128 }
   0x5   :  { %p226_p0 = scmp.ne.s32.totalorder %s370_s0, %s225_s18  ;;  %p229_p1 = scmp.lt.u32.totalorder %s225_s18, %s370_s0 }
   0x7   :  { %p231_p2 = pnand %p229_p1, %p226_p0 }
   0x9   :  { %234 = shalt.err (!%p231_p2)
}
   0xa   :  { %s235_s23 = scalar_lea.vmem %s18_s13, 128  ;;  %p240_p4 = scmp.lt.s32.totalorder %s18_s13, %s18_s13 }
   0xb   :  { %p236_p3 = scmp.ne.s32.totalorder %s18_s13, %s235_s23  ;;  %p241_p5 = scmp.lt.s32.totalorder %s235_s23, %s235_s23 }
   0xd   :  { %p242_p6 = por %p241_p5, %p240_p4 }
   0xf   :  { %p243_p7 = pnand %p242_p6, %p236_p3 }
  0x11   :  { %246 = shalt.err (!%p243_p7)
}
  0x12   :  { %20 = dma.hbm_to_vmem [thread:$0]  %s370_s0, 128, %s18_s13, [#allocation3]  }
  0x13   :  { %s247_s28 = scalar_lea.hbm %s371_s1, 1024 }
  0x14   :  { %p248_p8 = scmp.ne.s32.totalorder %s371_s1, %s247_s28  ;;  %p251_p9 = scmp.lt.u32.totalorder %s247_s28, %s371_s1 }
  0x16   :  { %p253_p10 = pnand %p251_p9, %p248_p8 }
  0x18   :  { %256 = shalt.err (!%p253_p10)
}
  0x19   :  { %s257_s6 = scalar_lea.vmem %s324_s15, 1024  ;;  %p262_p12 = scmp.lt.s32.totalorder %s324_s15, %s324_s15 }
  0x1a   :  { %p258_p11 = scmp.ne.s32.totalorder %s324_s15, %s257_s6  ;;  %p263_p13 = scmp.lt.s32.totalorder %s257_s6, %s257_s6 }
  0x1c   :  { %p264_p0 = por %p263_p13, %p262_p12 }
  0x1e   :  { %p265_p1 = pnand %p264_p0, %p258_p11 }
  0x20   :  { %268 = shalt.err (!%p265_p1)
}
  0x21   :  { %s299_s0 = smov 64   ;;  %s300_s7 = smov 4  }
  0x22   :  { %32 = dma.hbm_to_vmem [thread:$0]  %s371_s1, 1024, %s324_s15, [#allocation6], %s299_s0, %s299_s0, %s300_s7  }
  0x23   :  { %291 = dma.done.wait [#allocation3], 128  }
  0x24   :  { %292 = vsyncadd [#allocation3], 4294967168 }
  0x25   :  { %293 = dma.done.wait [#allocation6], 1024  }
  0x26   :  { %294 = vsyncadd [#allocation6], 4294966272  ;;  %v301_v0 = vmov 0.0   ;;  %vm302_vm0 = vmmov 0   ;;  %v217_v1 = vld [vmem:[#allocation5] sm:$0xff]   ;;  %v218_v2 = vld [vmem:[#allocation5 + $0x8] sm:$0xff]  }
  0x27   :  { %190 = vmatprep.subr.bf16.mxu0 %v301_v0  ;;  %206 = vmatprep.mubr.msk.bf16.mxu0 %vm302_vm0, %v301_v0  ;;  %v219_v3 = vld [vmem:[#allocation5 + $0x10] sm:$0xff]   ;;  %v220_v4 = vld [vmem:[#allocation5 + $0x18] sm:$0xff]   ;;  %v221_v5 = vld [vmem:[#allocation5 + $0x20] sm:$0xff]   ;;  %s303_s11 = smov [#allocation7]  }
  0x28   :  { %191 = vmatpush3.bf16.msra.mxu0 %v217_v1  ;;  %v222_v6 = vld [vmem:[#allocation5 + $0x28] sm:$0xff]   ;;  %v223_v7 = vld [vmem:[#allocation5 + $0x30] sm:$0xff]   ;;  %v224_v8 = vld [vmem:[#allocation5 + $0x38] sm:$0xff]   ;;  %s162_s12 = sshll.u32 %s303_s11, 4  ;;  %s163_s12 = int_to_ptr.vmem [resolvable:$true] %s162_s12 }
  0x29   :  { %192 = vmatprep.subr.bf16.mxu0 %v301_v0  ;;  %v42_v9 = vld [vmem:[#allocation2] sm:$0xff]  ;;  %s269_s13 = scalar_lea.vmem %s163_s12, 128  ;;  %p274_p3 = scmp.lt.s32.totalorder %s163_s12, %s163_s12 }
  0x2a   :  { %v43_v10 = vpack.c.bf16 %v42_v9, %v42_v9  ;;  %v172_v11 = vld [vmem:[%s372_s2] ss:$0 sm:$0xff]  ;;  %p270_p2 = scmp.ne.s32.totalorder %s163_s12, %s269_s13  ;;  %p275_p4 = scmp.lt.s32.totalorder %s269_s13, %s269_s13 }
  0x2c   :  { %193 = vmatpush3.bf16.msra.mxu0 %v218_v2  ;;  %p276_p5 = por %p275_p4, %p274_p3 }
  0x2d   :  { %194 = vmatprep.subr.bf16.mxu0 %v301_v0 }
  0x2e   :  { %p277_p6 = pnand %p276_p5, %p270_p2 }
  0x30   :  { %195 = vmatpush3.bf16.msra.mxu0 %v219_v3 }
  0x31   :  { %196 = vmatprep.subr.bf16.mxu0 %v301_v0 }
  0x34   :  { %197 = vmatpush3.bf16.msra.mxu0 %v220_v4 }
  0x35   :  { %198 = vmatprep.subr.bf16.mxu0 %v301_v0 }
  0x38   :  { %199 = vmatpush3.bf16.msra.mxu0 %v221_v5 }
  0x39   :  { %200 = vmatprep.subr.bf16.mxu0 %v301_v0 }
  0x3c   :  { %201 = vmatpush3.bf16.msra.mxu0 %v222_v6 }
  0x3d   :  { %202 = vmatprep.subr.bf16.mxu0 %v301_v0 }
  0x40   :  { %203 = vmatpush3.bf16.msra.mxu0 %v223_v7 }
  0x41   :  { %204 = vmatprep.subr.bf16.mxu0 %v301_v0 }
  0x44   :  { %205 = vmatpush3.bf16.msra.mxu0 %v224_v8 }
  0x47   :  { %207 = vmatmul.mubr.bf16.vlgmr.msra.gmra.mrb[0].mxu0 %v43_v10 }
 0x11a   :  { %v149_v12 = vpop.f32.mrb[0].mxu0 }
 0x11b   :  { %v150_v13 = vadd.f32 %v172_v11, %v149_v12  ;;  %v208_v14 = vpop.f32.mrb[1].mxu0 }
 0x11c   :  { %v152_v15 = vpop.f32.mrb[2].mxu0 }
 0x11d   :  { %155 = vst [vmem:[#allocation7] sm:$0xff] %v150_v13  ;;  %v209_v16 = vpop.f32.mrb[3].mxu0 }
 0x11e   :  { %280 = shalt.err (!%p277_p6)
}
 0x11f   :  { %s281_s2 = scalar_lea.hbm %s373_s3, 128 }
 0x120   :  { %p282_p7 = scmp.ne.s32.totalorder %s373_s3, %s281_s2  ;;  %p285_p8 = scmp.lt.u32.totalorder %s281_s2, %s373_s3 }
 0x122   :  { %p287_p9 = pnand %p285_p8, %p282_p7 }
 0x124   :  { %290 = shalt.err (!%p287_p9)
}
 0x125   :  { %165 = dma.vmem_to_hbm [thread:$0]  %s163_s12, 128, %s373_s3, [#allocation4]  }
 0x126   :  { %295 = dma.done.wait [#allocation4], 128  }
 0x127   :  { %296 = vsyncadd [#allocation4], 4294967168 }
 0x128   :  { %169 = vsyncpa [#allocation3], 1 }
 0x129   :  { %170 = vsyncpa [#allocation6], 1 }
 0x12a   :  { %171 = vsyncpa [#allocation4], 1 }

</bundles_post_ra>
